<compile_context>
chip_gen: v7x
topology: tpu7x:2x2x1
jax: 0.10.0
libtpu: 0.0.40
codegen_flags: <defaults>
</compile_context>

<pallas_src>
import functools

import numpy as np
import jax
import jax.numpy as jnp
from jax.experimental import pallas as pl
from jax.experimental.pallas import tpu as pltpu


def _round_up(n, m):
    return ((n + m - 1) // m) * m


# ----------------------------------------------------------------------------
# Pallas kernel: fc1 + tanh + two tiny head matmuls, narrow lane stores.
# ----------------------------------------------------------------------------
def policy_kernel(x_ref, w1_ref, b1_ref, wmu_ref, bmu_ref, wsig_ref, bsig_ref,
                  mu_ref, sigma_ref):
    x = x_ref[...]                                            # (TB, S)  bf16

    # fc1 + tanh (f32 accumulation on the MXU, bias/activation in f32)
    h = jnp.dot(x, w1_ref[...], preferred_element_type=jnp.float32)
    h = jnp.tanh(h + b1_ref[...])                             # (TB, H)  f32
    hb = h.astype(wmu_ref.dtype)                              # bf16 for the MXU

    # mu head: plain linear, store only the A useful columns.
    mu = jnp.dot(hb, wmu_ref[...], preferred_element_type=jnp.float32) + bmu_ref[...]
    mu_ref[...] = mu.astype(mu_ref.dtype)

    # sigma head: softplus(+1e-5) applied only to the A sigma columns.
    zs = jnp.dot(hb, wsig_ref[...], preferred_element_type=jnp.float32) + bsig_ref[...]
    sigma_ref[...] = (jnp.logaddexp(zs, 0.0) + 1e-5).astype(sigma_ref.dtype)


# ----------------------------------------------------------------------------
# Wrapper: cast matmul inputs to bf16, tile the batch, emit mu/sigma directly.
# ----------------------------------------------------------------------------
def policy_forward(x, params, *, block_batch=1024, compute_dtype=jnp.bfloat16,
                   core_parallel=False):
    """x: (B, state_dim) float32 -> (mu, sigma), each (B, action_dim) float32."""
    w1, b1, wmu, bmu, wsig, bsig = params
    B, S = x.shape
    H = w1.shape[1]
    A = wmu.shape[1]

    # --- bf16 matmul inputs (f32 accumulation inside the kernel) ---
    xc = x.astype(compute_dtype)
    w1c = w1.astype(compute_dtype)
    wmuc = wmu.astype(compute_dtype)
    wsigc = wsig.astype(compute_dtype)
    b1f = b1.astype(jnp.float32)
    bmuf = bmu.astype(jnp.float32)
    bsigf = bsig.astype(jnp.float32)

    # --- batch tiling: multiple of 16 (bf16 sublane pack), >=2 grid steps when
    #     B permits, capped at block_batch rows per step. ---
    half = _round_up(max(pl.cdiv(B, 2), 16), 16)
    tb = min(_round_up(block_batch, 16), half)
    b_padded = _round_up(B, tb)
    if b_padded != B:
        xc = jnp.pad(xc, ((0, b_padded - B), (0, 0)))
    grid = (b_padded // tb,)

    # On v7x, CORE_PARALLEL shards the batch grid axis across the 2 TensorCores.
    batch_sem = pltpu.CORE_PARALLEL if core_parallel else "parallel"

    cost = pl.CostEstimate(
        flops=2 * b_padded * S * H + 4 * b_padded * H * A,
        transcendentals=b_padded * (H + 2 * A),
        bytes_accessed=(b_padded * S * 2 + S * H * 2 + H * 4
                        + 2 * H * A * 2 + 2 * A * 4 + 2 * b_padded * A * 4),
    )

    mu, sigma = pl.pallas_call(
        policy_kernel,
        out_shape=(jax.ShapeDtypeStruct((b_padded, A), jnp.float32),
                   jax.ShapeDtypeStruct((b_padded, A), jnp.float32)),
        grid=grid,
        in_specs=[
            pl.BlockSpec((tb, S), lambda i: (i, 0)),        # x: blocked over batch
            pl.BlockSpec((S, H), lambda i: (0, 0)),         # W1: full-resident
            pl.BlockSpec((1, H), lambda i: (0, 0)),         # b1
            pl.BlockSpec((H, A), lambda i: (0, 0)),         # Wmu
            pl.BlockSpec((1, A), lambda i: (0, 0)),         # bmu
            pl.BlockSpec((H, A), lambda i: (0, 0)),         # Wsig
            pl.BlockSpec((1, A), lambda i: (0, 0)),         # bsig
        ],
        out_specs=(pl.BlockSpec((tb, A), lambda i: (i, 0)),
                   pl.BlockSpec((tb, A), lambda i: (i, 0))),
        compiler_params=pltpu.CompilerParams(
            dimension_semantics=(batch_sem,)),
        cost_estimate=cost,
    )(xc, w1c, b1f, wmuc, bmuf, wsigc, bsigf)

    if b_padded != B:
        mu = mu[:B]
        sigma = sigma[:B]
    return mu, sigma


# ----------------------------------------------------------------------------
# Deterministic parameter init mimicking layer_init_orthogonal:
# orthogonal weight scaled by `std`, constant (zero) bias.
# ----------------------------------------------------------------------------
def orthogonal_init(key, out_features, in_features, std):
    a = jax.random.normal(key, (max(out_features, in_features),
                                min(out_features, in_features)), dtype=jnp.float32)
    q, r = jnp.linalg.qr(a)
    q = q * jnp.sign(jnp.diag(r))
    if out_features < in_features:
        q = q.T
    w = std * q[:out_features, :in_features]                  # torch layout (out, in)
    return w.T                                                # stored as (in, out)


def init_params(key, state_dim, action_dim, hidden_size):
    k1, k2, k3 = jax.random.split(key, 3)
    w1 = orthogonal_init(k1, hidden_size, state_dim, std=float(np.sqrt(2)))
    b1 = jnp.zeros((1, hidden_size), jnp.float32)
    wmu = orthogonal_init(k2, action_dim, hidden_size, std=0.01)
    bmu = jnp.zeros((1, action_dim), jnp.float32)
    wsig = orthogonal_init(k3, action_dim, hidden_size, std=0.01)
    bsig = jnp.zeros((1, action_dim), jnp.float32)
    return (w1, b1, wmu, bmu, wsig, bsig)


# ----------------------------------------------------------------------------
# References for correctness checks.
# ----------------------------------------------------------------------------
def policy_forward_ref_f32(x, params):
    """Pure-f32 reference matching the PyTorch module exactly."""
    w1, b1, wmu, bmu, wsig, bsig = params
    h = jnp.tanh(x @ w1 + b1)
    mu = h @ wmu + bmu
    sigma = jax.nn.softplus(h @ wsig + bsig) + 1e-5
    return mu, sigma


def policy_forward_ref_bf16(x, params, compute_dtype=jnp.bfloat16):
    """Reference that applies the same bf16 input quantization as the kernel."""
    w1, b1, wmu, bmu, wsig, bsig = params
    xc = x.astype(compute_dtype)
    h = jnp.dot(xc, w1.astype(compute_dtype),
                preferred_element_type=jnp.float32) + b1
    h = jnp.tanh(h)
    hb = h.astype(compute_dtype)
    mu = jnp.dot(hb, wmu.astype(compute_dtype),
                 preferred_element_type=jnp.float32) + bmu
    z = jnp.dot(hb, wsig.astype(compute_dtype),
                preferred_element_type=jnp.float32) + bsig
    sigma = jax.nn.softplus(z) + 1e-5
    return mu, sigma


if __name__ == "__main__":
    # Small demo shapes; hidden_size=128 keeps the hidden layer lane-dense,
    # heads stay tiny (A=4). Batch 64 -> tile 32 -> grid (2,).
    state_dim, action_dim, hidden_size = 16, 4, 128
    batch = 64

    key = jax.random.PRNGKey(0)
    kx, kp = jax.random.split(key)
    x = jax.random.normal(kx, (batch, state_dim), dtype=jnp.float32)
    params = init_params(kp, state_dim, action_dim, hidden_size)

    mu, sigma = policy_forward(x, params)
    jax.block_until_ready((mu, sigma))
    assert mu.shape == (batch, action_dim) and sigma.shape == (batch, action_dim)

    # Tight check vs a reference with identical bf16 input quantization.
    mu_q, sigma_q = policy_forward_ref_bf16(x, params)
    np.testing.assert_allclose(np.asarray(mu), np.asarray(mu_q), rtol=5e-3, atol=5e-3)
    np.testing.assert_allclose(np.asarray(sigma), np.asarray(sigma_q), rtol=5e-3, atol=5e-3)

    # Loose semantic check vs the pure-f32 PyTorch-equivalent math
    # (difference is only bf16 quantization of matmul inputs).
    mu_f, sigma_f = policy_forward_ref_f32(x, params)
    np.testing.assert_allclose(np.asarray(mu), np.asarray(mu_f), rtol=5e-2, atol=5e-2)
    np.testing.assert_allclose(np.asarray(sigma), np.asarray(sigma_f), rtol=5e-2, atol=5e-2)

    print("KERNEL_OK")
</pallas_src>

<mosaic_0001>
module attributes {stable_mosaic.version = 11 : i64} {
  func.func @policy_kernel(%arg0: i32, %arg1: memref<32x16xbf16, #tpu.memory_space<vmem>>, %arg2: memref<16x128xbf16, #tpu.memory_space<vmem>>, %arg3: memref<1x128xf32, #tpu.memory_space<vmem>>, %arg4: memref<128x4xbf16, #tpu.memory_space<vmem>>, %arg5: memref<1x4xf32, #tpu.memory_space<vmem>>, %arg6: memref<128x4xbf16, #tpu.memory_space<vmem>>, %arg7: memref<1x4xf32, #tpu.memory_space<vmem>>, %arg8: memref<32x4xf32, #tpu.memory_space<vmem>>, %arg9: memref<32x4xf32, #tpu.memory_space<vmem>>) attributes {dimension_semantics = [#tpu.dimension_semantics<parallel>], iteration_bounds = array<i64: 2>, scalar_prefetch = 0 : i64, scratch_operands = 0 : i64, tpu.core_type = #tpu.core_type<tc>, window_params = [{transform_indices = @transform_0, window_bounds = array<i64: 32, 16>}, {pipeline_mode = #tpu.pipeline_mode<synchronous>, transform_indices = @transform_1, window_bounds = array<i64: 16, 128>}, {pipeline_mode = #tpu.pipeline_mode<synchronous>, transform_indices = @transform_2, window_bounds = array<i64: 1, 128>}, {pipeline_mode = #tpu.pipeline_mode<synchronous>, transform_indices = @transform_3, window_bounds = array<i64: 128, 4>}, {pipeline_mode = #tpu.pipeline_mode<synchronous>, transform_indices = @transform_4, window_bounds = array<i64: 1, 4>}, {pipeline_mode = #tpu.pipeline_mode<synchronous>, transform_indices = @transform_5, window_bounds = array<i64: 128, 4>}, {pipeline_mode = #tpu.pipeline_mode<synchronous>, transform_indices = @transform_6, window_bounds = array<i64: 1, 4>}, {transform_indices = @transform_7, window_bounds = array<i64: 32, 4>}, {transform_indices = @transform_8, window_bounds = array<i64: 32, 4>}]} {
    %c0 = arith.constant 0 : index
    %c0_0 = arith.constant 0 : index
    %0 = vector.load %arg1[%c0, %c0_0] : memref<32x16xbf16, #tpu.memory_space<vmem>>, vector<32x16xbf16>
    %c0_1 = arith.constant 0 : index
    %c0_2 = arith.constant 0 : index
    %1 = vector.load %arg2[%c0_1, %c0_2] : memref<16x128xbf16, #tpu.memory_space<vmem>>, vector<16x128xbf16>
    %cst = arith.constant dense<0.000000e+00> : vector<32x128xf32>
    %2 = tpu.matmul %0, %1, %cst {dimension_numbers = #tpu.dot_dimension_numbers<[1], [0], [0], [1], [0, 0, 1, 1], [], []>} : vector<32x16xbf16>, vector<16x128xbf16>, vector<32x128xf32> -> vector<32x128xf32>
    %c0_3 = arith.constant 0 : index
    %c0_4 = arith.constant 0 : index
    %3 = vector.load %arg3[%c0_3, %c0_4] : memref<1x128xf32, #tpu.memory_space<vmem>>, vector<1x128xf32>
    %4 = vector.broadcast %3 : vector<1x128xf32> to vector<32x128xf32>
    %5 = arith.addf %2, %4 : vector<32x128xf32>
    %6 = math.tanh %5 : vector<32x128xf32>
    %7 = arith.truncf %6 : vector<32x128xf32> to vector<32x128xbf16>
    %c0_5 = arith.constant 0 : index
    %c0_6 = arith.constant 0 : index
    %8 = vector.load %arg4[%c0_5, %c0_6] : memref<128x4xbf16, #tpu.memory_space<vmem>>, vector<128x4xbf16>
    %cst_7 = arith.constant dense<0.000000e+00> : vector<32x4xf32>
    %9 = tpu.matmul %7, %8, %cst_7 {dimension_numbers = #tpu.dot_dimension_numbers<[1], [0], [0], [1], [0, 0, 1, 1], [], []>} : vector<32x128xbf16>, vector<128x4xbf16>, vector<32x4xf32> -> vector<32x4xf32>
    %c0_8 = arith.constant 0 : index
    %c0_9 = arith.constant 0 : index
    %10 = vector.load %arg5[%c0_8, %c0_9] : memref<1x4xf32, #tpu.memory_space<vmem>>, vector<1x4xf32>
    %11 = vector.broadcast %10 : vector<1x4xf32> to vector<32x4xf32>
    %12 = arith.addf %9, %11 : vector<32x4xf32>
    %c0_10 = arith.constant 0 : index
    %c0_11 = arith.constant 0 : index
    %13 = vector.load %arg8[%c0_10, %c0_11] : memref<32x4xf32, #tpu.memory_space<vmem>>, vector<32x4xf32>
    tpu.vector_store %arg8[%c0_10, %c0_11], %12 {strides = array<i32>} : memref<32x4xf32, #tpu.memory_space<vmem>>, vector<32x4xf32>,
    %c0_12 = arith.constant 0 : index
    %c0_13 = arith.constant 0 : index
    %14 = vector.load %arg6[%c0_12, %c0_13] : memref<128x4xbf16, #tpu.memory_space<vmem>>, vector<128x4xbf16>
    %cst_14 = arith.constant dense<0.000000e+00> : vector<32x4xf32>
    %15 = tpu.matmul %7, %14, %cst_14 {dimension_numbers = #tpu.dot_dimension_numbers<[1], [0], [0], [1], [0, 0, 1, 1], [], []>} : vector<32x128xbf16>, vector<128x4xbf16>, vector<32x4xf32> -> vector<32x4xf32>
    %c0_15 = arith.constant 0 : index
    %c0_16 = arith.constant 0 : index
    %16 = vector.load %arg7[%c0_15, %c0_16] : memref<1x4xf32, #tpu.memory_space<vmem>>, vector<1x4xf32>
    %17 = vector.broadcast %16 : vector<1x4xf32> to vector<32x4xf32>
    %18 = arith.addf %15, %17 : vector<32x4xf32>
    %cst_17 = arith.constant 0.000000e+00 : f32
    %19 = vector.broadcast %cst_17 : f32 to vector<32x4xf32>
    %20 = arith.maximumf %18, %19 : vector<32x4xf32>
    %21 = vector.broadcast %cst_17 : f32 to vector<32x4xf32>
    %22 = arith.subf %18, %21 : vector<32x4xf32>
    %23 = arith.cmpf one, %22, %22 : vector<32x4xf32>
    %24 = vector.broadcast %cst_17 : f32 to vector<32x4xf32>
    %25 = arith.addf %18, %24 : vector<32x4xf32>
    %26 = math.absf %22 : vector<32x4xf32>
    %cst_18 = arith.constant 0.000000e+00 : f32
    %27 = vector.broadcast %cst_18 : f32 to vector<32x4xf32>
    %28 = arith.subf %27, %26 : vector<32x4xf32>
    %29 = math.exp %28 : vector<32x4xf32>
    %30 = math.log1p %29 : vector<32x4xf32>
    %31 = arith.addf %20, %30 : vector<32x4xf32>
    %32 = arith.select %23, %25, %31 : vector<32x4xi1>, vector<32x4xf32>
    %cst_19 = arith.constant 9.99999974E-6 : f32
    %33 = vector.broadcast %cst_19 : f32 to vector<32x4xf32>
    %34 = arith.addf %32, %33 : vector<32x4xf32>
    %c0_20 = arith.constant 0 : index
    %c0_21 = arith.constant 0 : index
    %35 = vector.load %arg9[%c0_20, %c0_21] : memref<32x4xf32, #tpu.memory_space<vmem>>, vector<32x4xf32>
    tpu.vector_store %arg9[%c0_20, %c0_21], %34 {strides = array<i32>} : memref<32x4xf32, #tpu.memory_space<vmem>>, vector<32x4xf32>,
    return
  }
  func.func @transform_0(%arg0: i32) -> (i32, i32) {
    %c0_i32 = arith.constant 0 : i32
    %c0_i32_0 = arith.constant 0 : i32
    return %arg0, %c0_i32 : i32, i32
  }
  func.func @transform_1(%arg0: i32) -> (i32, i32) {
    %c0_i32 = arith.constant 0 : i32
    %c0_i32_0 = arith.constant 0 : i32
    %c0_i32_1 = arith.constant 0 : i32
    return %c0_i32, %c0_i32_0 : i32, i32
  }
  func.func @transform_2(%arg0: i32) -> (i32, i32) {
    %c0_i32 = arith.constant 0 : i32
    %c0_i32_0 = arith.constant 0 : i32
    %c0_i32_1 = arith.constant 0 : i32
    return %c0_i32, %c0_i32_0 : i32, i32
  }
  func.func @transform_3(%arg0: i32) -> (i32, i32) {
    %c0_i32 = arith.constant 0 : i32
    %c0_i32_0 = arith.constant 0 : i32
    %c0_i32_1 = arith.constant 0 : i32
    return %c0_i32, %c0_i32_0 : i32, i32
  }
  func.func @transform_4(%arg0: i32) -> (i32, i32) {
    %c0_i32 = arith.constant 0 : i32
    %c0_i32_0 = arith.constant 0 : i32
    %c0_i32_1 = arith.constant 0 : i32
    return %c0_i32, %c0_i32_0 : i32, i32
  }
  func.func @transform_5(%arg0: i32) -> (i32, i32) {
    %c0_i32 = arith.constant 0 : i32
    %c0_i32_0 = arith.constant 0 : i32
    %c0_i32_1 = arith.constant 0 : i32
    return %c0_i32, %c0_i32_0 : i32, i32
  }
  func.func @transform_6(%arg0: i32) -> (i32, i32) {
    %c0_i32 = arith.constant 0 : i32
    %c0_i32_0 = arith.constant 0 : i32
    %c0_i32_1 = arith.constant 0 : i32
    return %c0_i32, %c0_i32_0 : i32, i32
  }
  func.func @transform_7(%arg0: i32) -> (i32, i32) {
    %c0_i32 = arith.constant 0 : i32
    %c0_i32_0 = arith.constant 0 : i32
    return %arg0, %c0_i32 : i32, i32
  }
  func.func @transform_8(%arg0: i32) -> (i32, i32) {
    %c0_i32 = arith.constant 0 : i32
    %c0_i32_0 = arith.constant 0 : i32
    return %arg0, %c0_i32 : i32, i32
  }
}

</mosaic_0001>

<bundles_post_ra>
// kernel: tpu_custom_call.1
= control target key start
LH: loop header
LB: loop body
LE: loop exit
PB: predicated region body
PF: predicated region fallthrough
CT: control target
= control target key end

     0   :  { %s1040_s27 = smov 0   ;;  %s1164_s0 = inlined_call_operand.vmem [shape: bf16[64,16], index: 0, kind: input, shape index: {}]   ;;  %s1165_s1 = inlined_call_operand.vmem [shape: bf16[16,128], index: 1, kind: input, shape index: {}]   ;;  %s1166_s2 = inlined_call_operand.vmem [shape: f32[1,128], index: 2, kind: input, shape index: {}]   ;;  %s1167_s3 = inlined_call_operand.vmem [shape: bf16[128,4], index: 3, kind: input, shape index: {}]   ;;  %s1168_s4 = inlined_call_operand.vmem [shape: f32[1,4], index: 4, kind: input, shape index: {}]   ;;  %s1169_s5 = inlined_call_operand.vmem [shape: bf16[128,4], index: 5, kind: input, shape index: {}]   ;;  %s1170_s6 = inlined_call_operand.vmem [shape: f32[1,4], index: 6, kind: input, shape index: {}]   ;;  %s1171_s7 = inlined_call_operand.vmem [shape: f32[64,4], index: 7, kind: output, shape index: {0}]   ;;  %s1172_s8 = inlined_call_operand.vmem [shape: f32[64,4], index: 8, kind: output, shape index: {1}]  }
   0x1 LB: > { %s830_s28 = sadd.s32 4294967295, %s993_s27   ;;  %p834_p0 = scmp.ge.s32.totalorder %s993_s27, 1  ;;  %s993_s27 = sphi %s1040_s27, %s19_s27  }
   0x2   : > { %p266_p1 = scmp.lt.s32.totalorder %s993_s27, 3 }
   0x4   : > { %p267_p2 = pnand %p834_p0, %p266_p1 }
   0x5   : > { %v944_v0 = vld [vmem:[%s1165_s1] sm:$0xff] (!%p267_p2)   ;;  %s835_s9 = sshll.u32 (!%p267_p2), %s830_s28, 2  ;;  %v949_v3 = vld [vmem:[%s1167_s3 + $0x8] sm:$0xff] (!%p267_p2)   ;;  %vm353_vm0 = vcmask (!%p267_p2), 130048   ;;  %v951_v5 = vld [vmem:[%s1167_s3 + $0x10] sm:$0xff] (!%p267_p2)   ;;  %vm535_vm1 = vcmask (!%p267_p2), 31744  }
   0x6   : > { %270 = sbr.rel (%p267_p2) target bundleno = 505 (0x1f9), region = 48  ;;  %p306_p3 = scmp.lt.s32.totalorder (!%p267_p2), %s835_s9, 7  ;;  %890 = vmatprep.subr.bf16.mxu0 (!%p267_p2), %v944_v0  ;;  %v947_v1 = vld [vmem:[%s1167_s3] sm:$0xff] (!%p267_p2)   ;;  %v950_v4 = vld [vmem:[%s1169_s5 + $0x8] sm:$0xff] (!%p267_p2)   ;;  %v952_v8 = vld [vmem:[%s1169_s5 + $0x10] sm:$0xff] (!%p267_p2)  }
   0x7   : > { %891 = vmatpush3.bf16.msra.mxu0 (!%p267_p2), %v944_v0  ;;  %v948_v2 = vld [vmem:[%s1169_s5] sm:$0xff] (!%p267_p2)   ;;  %896 = vmatprep.subr.bf16.mxu1 (!%p267_p2), %v947_v1  ;;  %v953_v9 = vld [vmem:[%s1167_s3 + $0x18] sm:$0xff] (!%p267_p2)   ;;  %v957_v13 = vld [vmem:[%s1167_s3 + $0x28] sm:$0xff] (!%p267_p2)  }
   0x8   : > { %916 = vmatprep.subr.bf16.mxu0 (!%p267_p2), %v948_v2  ;;  %897 = vmatpush3.bf16.msra.mxu1 (!%p267_p2), %v947_v1  ;;  %v954_v10 = vld [vmem:[%s1169_s5 + $0x18] sm:$0xff] (!%p267_p2)   ;;  %v955_v11 = vld [vmem:[%s1167_s3 + $0x20] sm:$0xff] (!%p267_p2)   ;;  %v958_v14 = vld [vmem:[%s1169_s5 + $0x28] sm:$0xff] (!%p267_p2)  }
   0x9   : > { %898 = vmatprep.subr.bf16.mxu1 (!%p267_p2), %v949_v3  ;;  %v956_v12 = vld [vmem:[%s1169_s5 + $0x20] sm:$0xff] (!%p267_p2)   ;;  %v959_v15 = vld [vmem:[%s1167_s3 + $0x30] sm:$0xff] (!%p267_p2)   ;;  %v961_v17 = vld [vmem:[%s1167_s3 + $0x38] sm:$0xff] (!%p267_p2)  }
   0xa   : > { %v960_v16 = vld [vmem:[%s1169_s5 + $0x30] sm:$0xff] (!%p267_p2)   ;;  %v962_v18 = vld [vmem:[%s1169_s5 + $0x38] sm:$0xff] (!%p267_p2)   ;;  %v841_v19 = vld [vmem:[%s1166_s2] ss:$0 sm:$0xff] (!%p267_p2) }
   0xb   : > { %v856_v34 = vld [vmem:[%s1170_s6] ss:$0 sm:$0xff] (!%p267_p2) }
   0xc   : > { %899 = vmatpush3.bf16.msra.mxu1 (!%p267_p2), %v949_v3  ;;  %v847_v35 = vld [vmem:[%s1168_s4] ss:$0 sm:$0xff] (!%p267_p2) }
   0xd   : > { %s1174_s9 = smov (!%p306_p3, %s835_s9), 7  ;;  %900 = vmatprep.subr.bf16.mxu1 %v951_v5 }
   0xe   : > { %s836_s16 = sshll.u32 %s1174_s9, 2  ;;  %s838_s10 = sshll.u32 %s1174_s9, 3 }
   0xf   : > { %s309_s19 = scalar_lea.vmem %s1164_s0, %s836_s16  ;;  %s315_s15 = scalar_lea.vmem %s1171_s7, %s838_s10 }
  0x10   : > { %v945_v6 = vld [vmem:[%s309_s19] sm:$0xff]   ;;  %v946_v7 = vld [vmem:[%s309_s19 + $0x8] sm:$0xff]   ;;  %901 = vmatpush3.bf16.msra.mxu1 %v951_v5  ;;  %s321_s18 = scalar_lea.vmem %s1172_s8, %s838_s10 }
  0x11   : > { %892 = vmatprep.mubr.msk.bf16.mxu0 %vm353_vm0, %v945_v6  ;;  %902 = vmatprep.subr.bf16.mxu1 %v953_v9 }
  0x12   : > { %893 = vmatmul.mubr.msk.bf16.vlgmr.msra.gmra.mrb[0].mxu0 %vm353_vm0, %v946_v7 }
  0x13   : > { %917 = vmatpush3.bf16.msra.mxu0 %v948_v2 }
  0x14   : > { %918 = vmatprep.subr.bf16.mxu0 %v950_v4  ;;  %903 = vmatpush3.bf16.msra.mxu1 %v953_v9 }
  0x15   : > { %904 = vmatprep.subr.bf16.mxu1 %v955_v11 }
  0x17   : > { %919 = vmatpush3.bf16.msra.mxu0 %v950_v4 }
  0x18   : > { %920 = vmatprep.subr.bf16.mxu0 %v952_v8  ;;  %905 = vmatpush3.bf16.msra.mxu1 %v955_v11 }
  0x19   : > { %906 = vmatprep.subr.bf16.mxu1 %v957_v13 }
  0x1b   : > { %921 = vmatpush3.bf16.msra.mxu0 %v952_v8 }
  0x1c   : > { %922 = vmatprep.subr.bf16.mxu0 %v954_v10  ;;  %907 = vmatpush3.bf16.msra.mxu1 %v957_v13 }
  0x1d   : > { %908 = vmatprep.subr.bf16.mxu1 %v959_v15 }
  0x1f   : > { %923 = vmatpush3.bf16.msra.mxu0 %v954_v10 }
  0x20   : > { %924 = vmatprep.subr.bf16.mxu0 %v956_v12  ;;  %909 = vmatpush3.bf16.msra.mxu1 %v959_v15 }
  0x21   : > { %910 = vmatprep.subr.bf16.mxu1 %v961_v17 }
  0x23   : > { %925 = vmatpush3.bf16.msra.mxu0 %v956_v12 }
  0x24   : > { %926 = vmatprep.subr.bf16.mxu0 %v958_v14  ;;  %911 = vmatpush3.bf16.msra.mxu1 %v961_v17 }
  0x27   : > { %927 = vmatpush3.bf16.msra.mxu0 %v958_v14 }
  0x28   : > { %928 = vmatprep.subr.bf16.mxu0 %v960_v16 }
  0x2b   : > { %929 = vmatpush3.bf16.msra.mxu0 %v960_v16 }
  0x2c   : > { %930 = vmatprep.subr.bf16.mxu0 %v962_v18 }
  0x2f   : > { %931 = vmatpush3.bf16.msra.mxu0 %v962_v18 }
  0xe5   : > { %v894_v20 = vpop.f32.mrb[0].mxu0 }
  0xe6   : > { %v403_v21 = vadd.f32 %v894_v20, %v841_v19  ;;  %v394_v22 = vpop.f32.mrb[1].mxu0 }
  0xe7   : > { %v395_v23 = vadd.f32 %v841_v19, %v394_v22  ;;  %v895_v24 = vpop.f32.mrb[2].mxu0 }
  0xe8   : > { %963 = vtanh.f32 %v403_v21  ;;  %v406_v25 = vadd.f32 %v895_v24, %v841_v19  ;;  %v397_v26 = vpop.f32.mrb[3].mxu0 }
  0xe9   : > { %965 = vtanh.f32 %v395_v23  ;;  %v398_v27 = vadd.f32 %v841_v19, %v397_v26 }
  0xea   : > { %967 = vtanh.f32 %v406_v25 }
  0xeb   : > { %969 = vtanh.f32 %v398_v27 }
  0xf2   : > { %v964_v28 = vpop.eup %963 }
  0xf3   : > { %v966_v29 = vpop.eup %965 }
  0xf4   : > { %v968_v30 = vpop.eup %967 }
  0xf5   : > { %v970_v31 = vpop.eup %969  ;;  %v414_v32 = vpack.c.bf16 %v968_v30, %v964_v28 }
  0xf6   : > { %v413_v33 = vpack.c.bf16 %v970_v31, %v966_v29 }
  0xf8   : > { %912 = vmatprep.mubr.bf16.mxu1 %v413_v33  ;;  %932 = vmatprep.mubr.bf16.mxu0 %v413_v33 }
  0xf9   : > { %913 = vmatmul.mubr.bf16.vlgmr.msra.gmra.mrb[0].mxu1 %v414_v32  ;;  %933 = vmatmul.mubr.bf16.vlgmr.msra.gmra.mrb[4].mxu0 %v414_v32 }
 0x1cc   : > { %v914_v36 = vpop.f32.mrb[0].mxu1  ;;  %v934_v37 = vpop.f32.mrb[4].mxu0 }
 0x1cd   : > { %v1115_v38 = vadd.f32 %v934_v37, %v856_v34  ;;  %v520_v39 = vpop.f32.mrb[1].mxu1  ;;  %v645_v40 = vpop.f32.mrb[5].mxu0  ;;  %v529_v53 = vadd.f32 %v914_v36, %v847_v35 }
 0x1ce   : > { %v521_v41 = vadd.f32 %v847_v35, %v520_v39  ;;  %v1122_v42 = vadd.f32 %v856_v34, %v645_v40  ;;  %v915_v43 = vpop.f32.mrb[2].mxu1  ;;  %v935_v44 = vpop.f32.mrb[6].mxu0 }
 0x1cf   : > { %v674_v45 = vand.u32 2147483647, %v1115_v38  ;;  %v523_v46 = vpop.f32.mrb[3].mxu1  ;;  %v648_v47 = vpop.f32.mrb[7].mxu0  ;;  %v1127_v49 = vadd.f32 %v935_v44, %v856_v34  ;;  %v532_v57 = vadd.f32 %v915_v43, %v847_v35  ;;  %538 = vst.msk [vmem:[%s315_s15 + $0x10] sm:$0xff] %vm535_vm1, %v529_v53  ;;  %v662_v20 = vmax.f32 %v1115_v38, 0.0 }
 0x1d0   : > { %536 = vst.msk [vmem:[%s315_s15] sm:$0xff] %vm535_vm1, %v521_v41  ;;  %v672_v48 = vand.u32 2147483647, %v1122_v42  ;;  %v524_v51 = vadd.f32 %v847_v35, %v523_v46  ;;  %v1129_v52 = vadd.f32 %v856_v34, %v648_v47  ;;  %v660_v29 = vmax.f32 %v1122_v42, 0.0 }
 0x1d1   : > { %v678_v50 = vsub.f32 0.0, %v674_v45  ;;  %v675_v55 = vand.u32 2147483647, %v1127_v49  ;;  %539 = vst.msk [vmem:[%s315_s15 + $0x18] sm:$0xff] %vm535_vm1, %v532_v57  ;;  %v663_v30 = vmax.f32 %v1127_v49, 0.0  ;;  %vm664_vm5 = vcmp.ne.f32.partialorder %v1122_v42, %v1122_v42 }
 0x1d2   : > { %v676_v54 = vsub.f32 0.0, %v672_v48  ;;  %537 = vst.msk [vmem:[%s315_s15 + $0x8] sm:$0xff] %vm535_vm1, %v524_v51  ;;  %v673_v58 = vand.u32 2147483647, %v1129_v52  ;;  %v661_v41 = vmax.f32 %v1129_v52, 0.0  ;;  %vm666_vm7 = vcmp.ne.f32.partialorder %v1115_v38, %v1115_v38 }
 0x1d3   : > { %v684_v56 = vmul.f32 1.442695, %v678_v50  ;;  %v679_v60 = vsub.f32 0.0, %v675_v55  ;;  %vm667_vm8 = vcmp.ne.f32.partialorder %v1127_v49, %v1127_v49  ;;  %vm665_vm9 = vcmp.ne.f32.partialorder %v1129_v52, %v1129_v52 }
 0x1d4   : > { %v680_v59 = vmul.f32 1.442695, %v676_v54  ;;  %v677_v61 = vsub.f32 0.0, %v673_v58 }
 0x1d5   : > { %971 = vpow2.f32 %v684_v56  ;;  %v686_v62 = vmul.f32 1.442695, %v679_v60 }
 0x1d6   : > { %973 = vpow2.f32 %v680_v59  ;;  %v682_v63 = vmul.f32 1.442695, %v677_v61 }
 0x1d7   : > { %975 = vpow2.f32 %v686_v62 }
 0x1d8   : > { %977 = vpow2.f32 %v682_v63 }
 0x1df   : > { %v972_v0 = vpop.eup %971 }
 0x1e0   : > { %v974_v1 = vpop.eup %973  ;;  %v706_v2 = vadd.f32 1.0, %v972_v0  ;;  %v709_v8 = vmul.f32 -0.5, %v972_v0  ;;  %v712_v13 = vand.u32 2147483647, %v972_v0 }
 0x1e1   : > { %v688_v3 = vadd.f32 1.0, %v974_v1  ;;  %v976_v4 = vpop.eup %975  ;;  %v691_v9 = vmul.f32 -0.5, %v974_v1  ;;  %v694_v15 = vand.u32 2147483647, %v974_v1 }
 0x1e2   : > { %979 = vlog2.f32 %v706_v2  ;;  %v978_v5 = vpop.eup %977  ;;  %v715_v6 = vadd.f32 1.0, %v976_v4  ;;  %v718_v10 = vmul.f32 -0.5, %v976_v4  ;;  %v710_v11 = vadd.f32 1.0, %v709_v8 }
 0x1e3   : > { %981 = vlog2.f32 %v688_v3  ;;  %v697_v7 = vadd.f32 1.0, %v978_v5  ;;  %v700_v12 = vmul.f32 -0.5, %v978_v5  ;;  %v692_v14 = vadd.f32 1.0, %v691_v9 }
 0x1e4   : > { %983 = vlog2.f32 %v715_v6  ;;  %v719_v17 = vadd.f32 1.0, %v718_v10  ;;  %v721_v18 = vand.u32 2147483647, %v976_v4  ;;  %v711_v22 = vmul.f32 %v972_v0, %v710_v11 }
 0x1e5   : > { %985 = vlog2.f32 %v697_v7  ;;  %v701_v23 = vadd.f32 1.0, %v700_v12  ;;  %vm713_vm2 = vcmp.lt.f32.partialorder %v712_v13, 0.0004427343  ;;  %v693_v25 = vmul.f32 %v974_v1, %v692_v14 }
 0x1e6   : > { %v703_v26 = vand.u32 2147483647, %v978_v5  ;;  %vm695_vm3 = vcmp.lt.f32.partialorder %v694_v15, 0.0004427343  ;;  %v720_v34 = vmul.f32 %v976_v4, %v719_v17  ;;  %vm722_vm4 = vcmp.lt.f32.partialorder %v721_v18, 0.0004427343 }
 0x1e7   : > { %v702_v39 = vmul.f32 %v978_v5, %v701_v23 }
 0x1e8   : > { %vm704_vm6 = vcmp.lt.f32.partialorder %v703_v26, 0.0004427343 }
 0x1ec   : > { %v980_v16 = vpop.eup %979 }
 0x1ed   : > { %v982_v19 = vpop.eup %981  ;;  %v708_v21 = vmul.f32 0.6931472, %v980_v16 }
 0x1ee   : > { %v690_v24 = vmul.f32 0.6931472, %v982_v19  ;;  %v984_v27 = vpop.eup %983 }
 0x1ef   : > { %v714_v28 = vsel %vm713_vm2, %v711_v22, %v708_v21  ;;  %v986_v31 = vpop.eup %985  ;;  %v717_v33 = vmul.f32 0.6931472, %v984_v27 }
 0x1f0   : > { %v696_v32 = vsel %vm695_vm3, %v693_v25, %v690_v24  ;;  %v726_v35 = vadd.f32 %v714_v28, %v662_v20  ;;  %v699_v37 = vmul.f32 0.6931472, %v986_v31 }
 0x1f1   : > { %v724_v36 = vadd.f32 %v696_v32, %v660_v29  ;;  %v723_v40 = vsel %vm722_vm4, %v720_v34, %v717_v33 }
 0x1f2   : > { %v727_v44 = vadd.f32 %v723_v40, %v663_v30  ;;  %v705_v45 = vsel %vm704_vm6, %v702_v39, %v699_v37  ;;  %v730_v48 = vsel %vm666_vm7, %v1115_v38, %v726_v35 }
 0x1f3   : > { %v728_v43 = vsel %vm664_vm5, %v1122_v42, %v724_v36  ;;  %v725_v47 = vadd.f32 %v705_v45, %v661_v41  ;;  %v734_v53 = vadd.f32 1e-05, %v730_v48 }
 0x1f4   : > { %v732_v46 = vadd.f32 1e-05, %v728_v43  ;;  %v731_v50 = vsel %vm667_vm8, %v1127_v49, %v727_v44 }
 0x1f5   : > { %v729_v42 = vsel %vm665_vm9, %v1129_v52, %v725_v47  ;;  %v735_v54 = vadd.f32 1e-05, %v731_v50  ;;  %738 = vst.msk [vmem:[%s321_s18 + $0x10] sm:$0xff] %vm535_vm1, %v734_v53 }
 0x1f6   : > { %736 = vst.msk [vmem:[%s321_s18] sm:$0xff] %vm535_vm1, %v732_v46  ;;  %v733_v51 = vadd.f32 1e-05, %v729_v42 }
 0x1f7   : > { %739 = vst.msk [vmem:[%s321_s18 + $0x18] sm:$0xff] %vm535_vm1, %v735_v54 }
 0x1f8   : > { %737 = vst.msk [vmem:[%s321_s18 + $0x8] sm:$0xff] %vm535_vm1, %v733_v51 }
 0x1f9 PF: > { %s19_s27 = sadd.s32 1, %s993_s27  }
 0x1fa   : > { %p16_p4 = scmp.ge.s32.totalorder %s19_s27, 4  }
 0x1fc   :  { %18 = sbr.rel (!%p16_p4) target bundleno = 1 (0x1), region = 90 }

</bundles_post_ra>
